<compile_context>
chip_gen: v7x
topology: tpu7x:2x2x1
jax: 0.10.0
libtpu: 0.0.40
codegen_flags: <defaults>
</compile_context>

<pallas_src>
import jax
import jax.numpy as jnp
from jax.experimental import pallas as pl
from jax.experimental.pallas import tpu as pltpu


# ---------------------------------------------------------------------------
# Fast path: aliased no-op kernel (zero data movement).
# ---------------------------------------------------------------------------
def _noop_kernel(x_ref, o_ref):
    del x_ref
    # Fake read+write dependency: keeps the aliased output "produced" without
    # issuing any DMA or vector load/store.
    pltpu.touch(o_ref)


def _identity_noop(x):
    return pl.pallas_call(
        _noop_kernel,
        out_shape=jax.ShapeDtypeStruct(x.shape, x.dtype),
        in_specs=[pl.BlockSpec(memory_space=pl.ANY)],   # raw HBM ref, no auto-DMA
        out_specs=pl.BlockSpec(memory_space=pl.ANY),
        input_output_aliases={0: 0},                    # output IS the input buffer
        cost_estimate=pl.CostEstimate(flops=0, transcendentals=0, bytes_accessed=0),
        compiler_params=pltpu.CompilerParams(has_side_effects=True),
    )(x)


# ---------------------------------------------------------------------------
# Fallback: lane-dense, double-buffered tiled copy (generation-aware sizing).
# ---------------------------------------------------------------------------
def _copy_kernel(x_ref, o_ref):
    o_ref[...] = x_ref[...]


_MAX_LANE_COLS = 8192  # lane-dense width cap (multiple of 128)


def _vmem_capacity_bytes():
    try:
        return int(pltpu.get_tpu_info().vmem_capacity_bytes)
    except Exception:
        return 64 * 1024 * 1024  # conservative (v7x physical VMEM per TC)


def _pick_cols(total):
    """Trailing dim: prefer lane-dense multiple of 128, else the largest divisor <= cap."""
    if total % 128 == 0:
        cols = 128
        while total % (cols * 2) == 0 and cols * 2 <= _MAX_LANE_COLS:
            cols *= 2
        return cols
    best = 1
    for c in range(2, min(total, _MAX_LANE_COLS) + 1):
        if total % c == 0:
            best = c
    return best


def _identity_copy(x):
    orig_shape = x.shape
    itemsize = jnp.dtype(x.dtype).itemsize
    total = x.size

    cols = _pick_cols(total)
    rows = total // cols
    x2 = x.reshape(rows, cols)

    # Generation-aware budget: v5e/v6e (128 MiB) -> 96 MiB limit / 16 MiB blocks,
    # v7x (64 MiB) -> 48 MiB limit / 8 MiB blocks.  4x block (dbl-buffered in+out)
    # stays well inside the limit.
    vmem_cap = _vmem_capacity_bytes()
    vmem_limit = min(int(vmem_cap * 0.75), 96 * 1024 * 1024)
    target_block_bytes = max(512 * 1024, vmem_limit // 6)

    sub = max(8, 32 // itemsize)  # sublane packing multiple for sub-32-bit dtypes
    rows_per_block = (target_block_bytes // (cols * itemsize)) // sub * sub
    rows_per_block = max(sub, rows_per_block)
    if rows_per_block >= rows:
        rows_per_block = rows     # whole-array block (always a legal BlockSpec)
    grid = (pl.cdiv(rows, rows_per_block),)

    out = pl.pallas_call(
        _copy_kernel,
        out_shape=jax.ShapeDtypeStruct((rows, cols), x2.dtype),
        grid_spec=pl.GridSpec(
            grid=grid,
            in_specs=[pl.BlockSpec((rows_per_block, cols), lambda i: (i, 0))],
            out_specs=pl.BlockSpec((rows_per_block, cols), lambda i: (i, 0)),
        ),
        input_output_aliases={0: 0},
        cost_estimate=pl.CostEstimate(
            flops=0, transcendentals=0, bytes_accessed=2 * total * itemsize),
        compiler_params=pltpu.CompilerParams(
            dimension_semantics=("parallel",),   # row axis independent -> megacore
            vmem_limit_bytes=vmem_limit,
        ),
    )(x2)
    return out.reshape(orig_shape)


# ---------------------------------------------------------------------------
# Public entry point: EmptyModule.forward
# ---------------------------------------------------------------------------
def empty_module_forward(x):
    """Pallas implementation of EmptyModule.forward: returns x unchanged."""
    if x.size == 0:
        return x  # nothing to do, launch no kernel
    try:
        y = _identity_noop(x)
        return jax.block_until_ready(y)
    except Exception:
        # Extremely defensive: if the ANY-space no-op path fails to lower on
        # this backend, fall back to the proven streaming copy.
        return _identity_copy(x)


if __name__ == "__main__":
    key = jax.random.PRNGKey(0)
    # Small NCHW-like input consistent with a generic forward(x).
    x = jax.random.normal(key, (2, 4, 16, 16), dtype=jnp.float32)
    y = empty_module_forward(x)
    y = jax.block_until_ready(y)
    assert y.shape == x.shape and y.dtype == x.dtype
    assert bool(jnp.all(y == x))

    # Arbitrary (non-128-divisible) shape sanity check: identity must hold for any x.
    x_odd = jax.random.normal(jax.random.PRNGKey(1), (3, 5, 7), dtype=jnp.float32)
    y_odd = jax.block_until_ready(empty_module_forward(x_odd))
    assert y_odd.shape == x_odd.shape and bool(jnp.all(y_odd == x_odd))

    print("KERNEL_OK")
</pallas_src>

<mosaic_0001>
module attributes {stable_mosaic.version = 11 : i64} {
  func.func @_noop_kernel(%arg0: memref<2x4x16x16xf32, #tpu.memory_space<any>>, %arg1: memref<2x4x16x16xf32, #tpu.memory_space<any>>) attributes {dimension_semantics = [], scalar_prefetch = 0 : i64, scratch_operands = 0 : i64, tpu.core_type = #tpu.core_type<tc>} {
    return
  }
}

module attributes {stable_mosaic.version = 11 : i64} {
  func.func @_copy_kernel(%arg0: i32, %arg1: memref<1x2048xf32, #tpu.memory_space<vmem>>, %arg2: memref<1x2048xf32, #tpu.memory_space<vmem>>) attributes {dimension_semantics = [#tpu.dimension_semantics<parallel>], iteration_bounds = array<i64: 1>, scalar_prefetch = 0 : i64, scratch_operands = 0 : i64, tpu.core_type = #tpu.core_type<tc>, window_params = [{transform_indices = @transform_0, window_bounds = array<i64: 1, 2048>}, {transform_indices = @transform_1, window_bounds = array<i64: 1, 2048>}]} {
    %c0 = arith.constant 0 : index
    %c0_0 = arith.constant 0 : index
    %0 = vector.load %arg1[%c0, %c0_0] : memref<1x2048xf32, #tpu.memory_space<vmem>>, vector<1x2048xf32>
    %c0_1 = arith.constant 0 : index
    %c0_2 = arith.constant 0 : index
    %1 = vector.load %arg2[%c0_1, %c0_2] : memref<1x2048xf32, #tpu.memory_space<vmem>>, vector<1x2048xf32>
    tpu.vector_store %arg2[%c0_1, %c0_2], %0 {strides = array<i32>} : memref<1x2048xf32, #tpu.memory_space<vmem>>, vector<1x2048xf32>,
    return
  }
  func.func @transform_0(%arg0: i32) -> (i32, i32) {
    %c0_i32 = arith.constant 0 : i32
    %c0_i32_0 = arith.constant 0 : i32
    return %arg0, %c0_i32 : i32, i32
  }
  func.func @transform_1(%arg0: i32) -> (i32, i32) {
    %c0_i32 = arith.constant 0 : i32
    %c0_i32_0 = arith.constant 0 : i32
    return %arg0, %c0_i32 : i32, i32
  }
}

</mosaic_0001>

<bundles_post_ra>
// kernel: tpu_custom_call.1
= control target key start
LH: loop header
LB: loop body
LE: loop exit
PB: predicated region body
PF: predicated region fallthrough
CT: control target
= control target key end

     0   :  { %s16_s0 = inlined_call_operand.hbm [shape: f32[2,4,16,16], index: 0, kind: input, shape index: {}, may-alias: {0,1}]   ;;  %s17_s1 = inlined_call_operand.hbm [shape: f32[2,4,16,16], index: 1, kind: output, shape index: {}, may-alias: {0,1}]  }

// kernel: tpu_custom_call.1
= control target key start
LH: loop header
LB: loop body
LE: loop exit
PB: predicated region body
PF: predicated region fallthrough
CT: control target
= control target key end

     0   :  { %6 = vsyncpa [#allocation3], 0  ;;  %s126_s0 = inlined_call_operand.hbm [shape: f32[1,2048], index: 0, kind: input, shape index: {}, may-alias: {0,1}]   ;;  %s127_s1 = inlined_call_operand.hbm [shape: f32[1,2048], index: 1, kind: output, shape index: {}, may-alias: {0,1}]  }
   0x1   :  { %7 = vsyncpa [#allocation4], 0  ;;  %s90_s6 = smov [#allocation2]   ;;  %s42_s10 = scalar_lea.hbm %s126_s0, 256 }
   0x2   :  { %s14_s7 = sshll.u32 %s90_s6, 4  ;;  %p43_p0 = scmp.ne.s32.totalorder %s126_s0, %s42_s10  ;;  %s15_s7 = int_to_ptr.vmem [resolvable:$true] %s14_s7 }
   0x3   :  { %p46_p1 = scmp.lt.u32.totalorder %s42_s10, %s126_s0 }
   0x5   :  { %p48_p2 = pnand %p46_p1, %p43_p0 }
   0x7   :  { %51 = shalt.err (!%p48_p2)
}
   0x8   :  { %s52_s15 = scalar_lea.vmem %s15_s7, 256  ;;  %p57_p4 = scmp.lt.s32.totalorder %s15_s7, %s15_s7 }
   0x9   :  { %p53_p3 = scmp.ne.s32.totalorder %s15_s7, %s52_s15  ;;  %p58_p5 = scmp.lt.s32.totalorder %s52_s15, %s52_s15 }
   0xb   :  { %p59_p6 = por %p58_p5, %p57_p4 }
   0xd   :  { %p60_p7 = pnand %p59_p6, %p53_p3 }
   0xf   :  { %63 = shalt.err (!%p60_p7)
}
  0x10   :  { %17 = dma.hbm_to_vmem [thread:$0]  %s126_s0, 256, %s15_s7, [#allocation3]  }
  0x11   :  { %86 = dma.done.wait [#allocation3], 256  }
  0x12   :  { %87 = vsyncadd [#allocation3], 4294967040  ;;  %s91_s18 = smov [#allocation5]   ;;  %v21_v0 = vld [vmem:[#allocation2] sm:$0xff]  ;;  %v22_v1 = vld [vmem:[#allocation2 + $0x8] sm:$0xff] }
  0x13   :  { %s31_s19 = sshll.u32 %s91_s18, 4  ;;  %23 = vst [vmem:[#allocation5] sm:$0xff] %v21_v0  ;;  %24 = vst [vmem:[#allocation5 + $0x8] sm:$0xff] %v22_v1  ;;  %s32_s19 = int_to_ptr.vmem [resolvable:$true] %s31_s19 }
  0x14   :  { %s64_s20 = scalar_lea.vmem %s32_s19, 256  ;;  %p69_p9 = scmp.lt.s32.totalorder %s32_s19, %s32_s19 }
  0x15   :  { %p65_p8 = scmp.ne.s32.totalorder %s32_s19, %s64_s20  ;;  %p70_p10 = scmp.lt.s32.totalorder %s64_s20, %s64_s20 }
  0x17   :  { %p71_p11 = por %p70_p10, %p69_p9 }
  0x19   :  { %p72_p12 = pnand %p71_p11, %p65_p8 }
  0x1b   :  { %75 = shalt.err (!%p72_p12)
}
  0x1c   :  { %s76_s0 = scalar_lea.hbm %s127_s1, 256 }
  0x1d   :  { %p77_p13 = scmp.ne.s32.totalorder %s127_s1, %s76_s0  ;;  %p80_p0 = scmp.lt.u32.totalorder %s76_s0, %s127_s1 }
  0x1f   :  { %p82_p1 = pnand %p80_p0, %p77_p13 }
  0x21   :  { %85 = shalt.err (!%p82_p1)
}
  0x22   :  { %34 = dma.vmem_to_hbm [thread:$0]  %s32_s19, 256, %s127_s1, [#allocation4]  }
  0x23   :  { %88 = dma.done.wait [#allocation4], 256  }
  0x24   :  { %89 = vsyncadd [#allocation4], 4294967040 }
  0x25   :  { %38 = vsyncpa [#allocation3], 1 }
  0x26   :  { %39 = vsyncpa [#allocation4], 1 }

</bundles_post_ra>
